<compile_context>
chip_gen: v7x
topology: tpu7x:2x2x1
jax: 0.10.0
libtpu: 0.0.40
codegen_flags: <defaults>
</compile_context>

<pallas_src>
import jax
import jax.numpy as jnp
from jax.experimental import pallas as pl
from jax.experimental.pallas import tpu as pltpu

EPS = 1e-5


def _make_prenorm_kernel(C: int):
    """Builds the fused LayerNorm + 1x1-conv kernel for channel count C.

    The 1x1 conv is unrolled over channels as scalar(SMEM) * vector FMAs on the
    VPU (appropriate for small C).
    """
    # TODO(synk): for large C (>=128) switch this to a bf16 MXU dot with the folded
    # weight resident in VMEM (preferred_element_type=f32) instead of unrolled FMAs.

    def kernel(x_ref, w_ref, b_ref, o_ref):
        # x_ref / o_ref : (1, C, tn) VMEM tiles (C on sublanes, pixels on lanes)
        # w_ref         : (C, C) folded conv weight in SMEM  w'[ci, co] = g[ci] * w[ci, co]
        # b_ref         : (C,)   folded conv bias   in SMEM  b'[co]    = (b @ w)[co] + wb[co]
        x = x_ref[0].astype(jnp.float32)                          # (C, tn)
        mean = jnp.mean(x, axis=0, keepdims=True)                 # (1, tn)
        var = jnp.mean((x - mean) ** 2, axis=0, keepdims=True)    # unbiased=False
        # eps is added to std (sqrt(var)+eps), matching the custom PyTorch module.
        inv = pl.reciprocal(jnp.sqrt(var) + EPS, approx=False)    # EUP path, f32-exact
        xc = (x - mean) * inv                                     # (C, tn)

        rows = []
        for o in range(C):
            acc = xc[0:1, :] * w_ref[0, o]                        # scalar * (1, tn)
            for c in range(1, C):
                acc = acc + xc[c:c + 1, :] * w_ref[c, o]
            rows.append(acc + b_ref[o])                           # (1, tn)
        y = jnp.concatenate(rows, axis=0)                         # (C, tn)
        o_ref[0] = y.astype(o_ref.dtype)

    return kernel


def prenorm_pallas(x_nchw, g, b, w, wb, *, max_tn=2048):
    """PreNorm(LayerNorm(dim), Conv2d(dim, dim, 1)) fused, NCHW-native.

    x_nchw: (N, C, H, W). g, b: (C,) LayerNorm affine.
    w: (C_in, C_out) conv weight (out = y_ln @ w). wb: (C_out,) conv bias.
    """
    N, C, H, W = x_nchw.shape
    HW = H * W
    x3 = x_nchw.reshape(N, C, HW)          # free reshape — no transpose / HBM round-trip

    # Largest lane-dense pixel tile: multiple of 128 dividing HW, capped at max_tn.
    if HW % 128 == 0:
        tn = 128
        cand = (max_tn // 128) * 128
        while cand >= 128:
            if HW % cand == 0:
                tn = cand
                break
            cand -= 128
    else:
        tn = HW                             # full-extent last dim is also allowed

    # Fold LayerNorm affine into the conv (once, in f32, outside the hot loop):
    #   ((x-mean)*inv*g + b) @ w + wb == ((x-mean)*inv) @ (g[:,None]*w) + (b @ w + wb)
    g32 = g.astype(jnp.float32)
    b32 = b.astype(jnp.float32)
    w32 = w.astype(jnp.float32)
    wb32 = wb.astype(jnp.float32)
    w_fold = g32[:, None] * w32                       # (C_in, C_out)
    b_fold = b32 @ w32 + wb32                         # (C_out,)

    grid = (N, HW // tn)
    out3 = pl.pallas_call(
        _make_prenorm_kernel(C),
        out_shape=jax.ShapeDtypeStruct((N, C, HW), x_nchw.dtype),
        grid_spec=pltpu.PrefetchScalarGridSpec(
            num_scalar_prefetch=0,
            grid=grid,
            in_specs=[
                pl.BlockSpec((1, C, tn), lambda n, j: (n, 0, j)),       # x tile (VMEM)
                pl.BlockSpec(memory_space=pltpu.MemorySpace.SMEM),      # folded weight
                pl.BlockSpec(memory_space=pltpu.MemorySpace.SMEM),      # folded bias
            ],
            out_specs=pl.BlockSpec((1, C, tn), lambda n, j: (n, 0, j)),
        ),
        compiler_params=pltpu.CompilerParams(
            dimension_semantics=("parallel", "parallel"),
            vmem_limit_bytes=32 * 1024 * 1024,
        ),
    )(x3, w_fold, b_fold)

    return out3.reshape(N, C, H, W)


def prenorm_reference(x_nchw, g, b, w, wb):
    """Pure-JAX mirror of the PyTorch PreNorm(LayerNorm(dim), Conv2d 1x1)."""
    x = x_nchw.astype(jnp.float32)
    mean = jnp.mean(x, axis=1, keepdims=True)
    var = jnp.mean((x - mean) ** 2, axis=1, keepdims=True)
    std = jnp.sqrt(var)
    y = (x - mean) / (std + EPS) * g.reshape(1, -1, 1, 1) + b.reshape(1, -1, 1, 1)
    # 1x1 conv, NCHW: out[n, o, h, w] = sum_c y[n, c, h, w] * w[c, o] + wb[o]
    out = jnp.einsum("nchw,co->nohw", y, w,
                     precision=jax.lax.Precision.HIGHEST) + wb.reshape(1, -1, 1, 1)
    return out.astype(x_nchw.dtype)


if __name__ == "__main__":
    key = jax.random.PRNGKey(0)
    N, C, H, W = 2, 4, 16, 16   # HW = 256 -> one lane-dense 256-wide tile per image

    kx, kw, kwb, kg, kb = jax.random.split(key, 5)
    x = jax.random.normal(kx, (N, C, H, W), dtype=jnp.float32)

    # LayerNorm params (module init is ones/zeros; perturb to exercise the folding path)
    g = 1.0 + 0.1 * jax.random.normal(kg, (C,), dtype=jnp.float32)
    b = 0.1 * jax.random.normal(kb, (C,), dtype=jnp.float32)
    # fn = 1x1 conv params, deterministic synthetic init
    w = jax.random.normal(kw, (C, C), dtype=jnp.float32) * 0.1
    wb = jax.random.normal(kwb, (C,), dtype=jnp.float32) * 0.1

    out = prenorm_pallas(x, g, b, w, wb)
    out = jax.block_until_ready(out)

    ref = prenorm_reference(x, g, b, w, wb)
    assert out.shape == (N, C, H, W)
    assert jnp.allclose(out, ref, atol=1e-4, rtol=1e-4), "mismatch vs reference"
    print("KERNEL_OK")
</pallas_src>

<mosaic_0001>
module attributes {stable_mosaic.version = 11 : i64} {
  func.func @kernel(%arg0: i32, %arg1: i32, %arg2: memref<1x4x256xf32, #tpu.memory_space<vmem>>, %arg3: memref<4x4xf32, #tpu.memory_space<smem>>, %arg4: memref<4xf32, #tpu.memory_space<smem>>, %arg5: memref<1x4x256xf32, #tpu.memory_space<vmem>>) attributes {dimension_semantics = [#tpu.dimension_semantics<parallel>, #tpu.dimension_semantics<parallel>], iteration_bounds = array<i64: 2, 1>, scalar_prefetch = 0 : i64, scratch_operands = 0 : i64, tpu.core_type = #tpu.core_type<tc>, window_params = [{transform_indices = @transform_0, window_bounds = array<i64: 1, 4, 256>}, {transform_indices = @transform_1, window_bounds = array<i64: 4, 4>}, {transform_indices = @transform_2, window_bounds = array<i64: 4>}, {transform_indices = @transform_3, window_bounds = array<i64: 1, 4, 256>}]} {
    %c0 = arith.constant 0 : index
    %c0_0 = arith.constant 0 : index
    %c0_1 = arith.constant 0 : index
    %0 = vector.load %arg2[%c0, %c0_0, %c0_1] : memref<1x4x256xf32, #tpu.memory_space<vmem>>, vector<1x4x256xf32>
    %1 = vector.shape_cast %0 : vector<1x4x256xf32> to vector<4x256xf32>
    %cst = arith.constant dense<0.000000e+00> : vector<256xf32>
    %2 = vector.multi_reduction <add>, %1, %cst [0] : vector<4x256xf32> to vector<256xf32>
    %3 = vector.shape_cast %2 : vector<256xf32> to vector<1x256xf32>
    %cst_2 = arith.constant 4.000000e+00 : f32
    %4 = vector.broadcast %cst_2 : f32 to vector<1x256xf32>
    %5 = arith.divf %3, %4 : vector<1x256xf32>
    %6 = vector.broadcast %5 : vector<1x256xf32> to vector<4x256xf32>
    %7 = arith.subf %1, %6 : vector<4x256xf32>
    %8 = arith.mulf %7, %7 : vector<4x256xf32>
    %cst_3 = arith.constant dense<0.000000e+00> : vector<256xf32>
    %9 = vector.multi_reduction <add>, %8, %cst_3 [0] : vector<4x256xf32> to vector<256xf32>
    %10 = vector.shape_cast %9 : vector<256xf32> to vector<1x256xf32>
    %cst_4 = arith.constant 4.000000e+00 : f32
    %11 = vector.broadcast %cst_4 : f32 to vector<1x256xf32>
    %12 = arith.divf %10, %11 : vector<1x256xf32>
    %13 = math.sqrt %12 : vector<1x256xf32>
    %cst_5 = arith.constant 9.99999974E-6 : f32
    %14 = vector.broadcast %cst_5 : f32 to vector<1x256xf32>
    %15 = arith.addf %13, %14 : vector<1x256xf32>
    %16 = tpu.reciprocal %15 : vector<1x256xf32> -> vector<1x256xf32>
    %17 = vector.broadcast %5 : vector<1x256xf32> to vector<4x256xf32>
    %18 = arith.subf %1, %17 : vector<4x256xf32>
    %19 = vector.broadcast %16 : vector<1x256xf32> to vector<4x256xf32>
    %20 = arith.mulf %18, %19 : vector<4x256xf32>
    %21 = vector.extract_strided_slice %20 {offsets = [0, 0], sizes = [1, 256], strides = [1, 1]} : vector<4x256xf32> to vector<1x256xf32>
    %c0_6 = arith.constant 0 : index
    %c0_7 = arith.constant 0 : index
    %22 = memref.load %arg3[%c0_6, %c0_7] : memref<4x4xf32, #tpu.memory_space<smem>>
    %23 = vector.broadcast %22 : f32 to vector<1x256xf32>
    %24 = arith.mulf %21, %23 : vector<1x256xf32>
    %25 = vector.extract_strided_slice %20 {offsets = [1, 0], sizes = [1, 256], strides = [1, 1]} : vector<4x256xf32> to vector<1x256xf32>
    %c1 = arith.constant 1 : index
    %c0_8 = arith.constant 0 : index
    %26 = memref.load %arg3[%c1, %c0_8] : memref<4x4xf32, #tpu.memory_space<smem>>
    %27 = vector.broadcast %26 : f32 to vector<1x256xf32>
    %28 = arith.mulf %25, %27 : vector<1x256xf32>
    %29 = arith.addf %24, %28 : vector<1x256xf32>
    %30 = vector.extract_strided_slice %20 {offsets = [2, 0], sizes = [1, 256], strides = [1, 1]} : vector<4x256xf32> to vector<1x256xf32>
    %c2 = arith.constant 2 : index
    %c0_9 = arith.constant 0 : index
    %31 = memref.load %arg3[%c2, %c0_9] : memref<4x4xf32, #tpu.memory_space<smem>>
    %32 = vector.broadcast %31 : f32 to vector<1x256xf32>
    %33 = arith.mulf %30, %32 : vector<1x256xf32>
    %34 = arith.addf %29, %33 : vector<1x256xf32>
    %35 = vector.extract_strided_slice %20 {offsets = [3, 0], sizes = [1, 256], strides = [1, 1]} : vector<4x256xf32> to vector<1x256xf32>
    %c3 = arith.constant 3 : index
    %c0_10 = arith.constant 0 : index
    %36 = memref.load %arg3[%c3, %c0_10] : memref<4x4xf32, #tpu.memory_space<smem>>
    %37 = vector.broadcast %36 : f32 to vector<1x256xf32>
    %38 = arith.mulf %35, %37 : vector<1x256xf32>
    %39 = arith.addf %34, %38 : vector<1x256xf32>
    %c0_11 = arith.constant 0 : index
    %40 = memref.load %arg4[%c0_11] : memref<4xf32, #tpu.memory_space<smem>>
    %41 = vector.broadcast %40 : f32 to vector<1x256xf32>
    %42 = arith.addf %39, %41 : vector<1x256xf32>
    %43 = vector.extract_strided_slice %20 {offsets = [0, 0], sizes = [1, 256], strides = [1, 1]} : vector<4x256xf32> to vector<1x256xf32>
    %c0_12 = arith.constant 0 : index
    %c1_13 = arith.constant 1 : index
    %44 = memref.load %arg3[%c0_12, %c1_13] : memref<4x4xf32, #tpu.memory_space<smem>>
    %45 = vector.broadcast %44 : f32 to vector<1x256xf32>
    %46 = arith.mulf %43, %45 : vector<1x256xf32>
    %47 = vector.extract_strided_slice %20 {offsets = [1, 0], sizes = [1, 256], strides = [1, 1]} : vector<4x256xf32> to vector<1x256xf32>
    %c1_14 = arith.constant 1 : index
    %c1_15 = arith.constant 1 : index
    %48 = memref.load %arg3[%c1_14, %c1_15] : memref<4x4xf32, #tpu.memory_space<smem>>
    %49 = vector.broadcast %48 : f32 to vector<1x256xf32>
    %50 = arith.mulf %47, %49 : vector<1x256xf32>
    %51 = arith.addf %46, %50 : vector<1x256xf32>
    %52 = vector.extract_strided_slice %20 {offsets = [2, 0], sizes = [1, 256], strides = [1, 1]} : vector<4x256xf32> to vector<1x256xf32>
    %c2_16 = arith.constant 2 : index
    %c1_17 = arith.constant 1 : index
    %53 = memref.load %arg3[%c2_16, %c1_17] : memref<4x4xf32, #tpu.memory_space<smem>>
    %54 = vector.broadcast %53 : f32 to vector<1x256xf32>
    %55 = arith.mulf %52, %54 : vector<1x256xf32>
    %56 = arith.addf %51, %55 : vector<1x256xf32>
    %57 = vector.extract_strided_slice %20 {offsets = [3, 0], sizes = [1, 256], strides = [1, 1]} : vector<4x256xf32> to vector<1x256xf32>
    %c3_18 = arith.constant 3 : index
    %c1_19 = arith.constant 1 : index
    %58 = memref.load %arg3[%c3_18, %c1_19] : memref<4x4xf32, #tpu.memory_space<smem>>
    %59 = vector.broadcast %58 : f32 to vector<1x256xf32>
    %60 = arith.mulf %57, %59 : vector<1x256xf32>
    %61 = arith.addf %56, %60 : vector<1x256xf32>
    %c1_20 = arith.constant 1 : index
    %62 = memref.load %arg4[%c1_20] : memref<4xf32, #tpu.memory_space<smem>>
    %63 = vector.broadcast %62 : f32 to vector<1x256xf32>
    %64 = arith.addf %61, %63 : vector<1x256xf32>
    %65 = vector.extract_strided_slice %20 {offsets = [0, 0], sizes = [1, 256], strides = [1, 1]} : vector<4x256xf32> to vector<1x256xf32>
    %c0_21 = arith.constant 0 : index
    %c2_22 = arith.constant 2 : index
    %66 = memref.load %arg3[%c0_21, %c2_22] : memref<4x4xf32, #tpu.memory_space<smem>>
    %67 = vector.broadcast %66 : f32 to vector<1x256xf32>
    %68 = arith.mulf %65, %67 : vector<1x256xf32>
    %69 = vector.extract_strided_slice %20 {offsets = [1, 0], sizes = [1, 256], strides = [1, 1]} : vector<4x256xf32> to vector<1x256xf32>
    %c1_23 = arith.constant 1 : index
    %c2_24 = arith.constant 2 : index
    %70 = memref.load %arg3[%c1_23, %c2_24] : memref<4x4xf32, #tpu.memory_space<smem>>
    %71 = vector.broadcast %70 : f32 to vector<1x256xf32>
    %72 = arith.mulf %69, %71 : vector<1x256xf32>
    %73 = arith.addf %68, %72 : vector<1x256xf32>
    %74 = vector.extract_strided_slice %20 {offsets = [2, 0], sizes = [1, 256], strides = [1, 1]} : vector<4x256xf32> to vector<1x256xf32>
    %c2_25 = arith.constant 2 : index
    %c2_26 = arith.constant 2 : index
    %75 = memref.load %arg3[%c2_25, %c2_26] : memref<4x4xf32, #tpu.memory_space<smem>>
    %76 = vector.broadcast %75 : f32 to vector<1x256xf32>
    %77 = arith.mulf %74, %76 : vector<1x256xf32>
    %78 = arith.addf %73, %77 : vector<1x256xf32>
    %79 = vector.extract_strided_slice %20 {offsets = [3, 0], sizes = [1, 256], strides = [1, 1]} : vector<4x256xf32> to vector<1x256xf32>
    %c3_27 = arith.constant 3 : index
    %c2_28 = arith.constant 2 : index
    %80 = memref.load %arg3[%c3_27, %c2_28] : memref<4x4xf32, #tpu.memory_space<smem>>
    %81 = vector.broadcast %80 : f32 to vector<1x256xf32>
    %82 = arith.mulf %79, %81 : vector<1x256xf32>
    %83 = arith.addf %78, %82 : vector<1x256xf32>
    %c2_29 = arith.constant 2 : index
    %84 = memref.load %arg4[%c2_29] : memref<4xf32, #tpu.memory_space<smem>>
    %85 = vector.broadcast %84 : f32 to vector<1x256xf32>
    %86 = arith.addf %83, %85 : vector<1x256xf32>
    %87 = vector.extract_strided_slice %20 {offsets = [0, 0], sizes = [1, 256], strides = [1, 1]} : vector<4x256xf32> to vector<1x256xf32>
    %c0_30 = arith.constant 0 : index
    %c3_31 = arith.constant 3 : index
    %88 = memref.load %arg3[%c0_30, %c3_31] : memref<4x4xf32, #tpu.memory_space<smem>>
    %89 = vector.broadcast %88 : f32 to vector<1x256xf32>
    %90 = arith.mulf %87, %89 : vector<1x256xf32>
    %91 = vector.extract_strided_slice %20 {offsets = [1, 0], sizes = [1, 256], strides = [1, 1]} : vector<4x256xf32> to vector<1x256xf32>
    %c1_32 = arith.constant 1 : index
    %c3_33 = arith.constant 3 : index
    %92 = memref.load %arg3[%c1_32, %c3_33] : memref<4x4xf32, #tpu.memory_space<smem>>
    %93 = vector.broadcast %92 : f32 to vector<1x256xf32>
    %94 = arith.mulf %91, %93 : vector<1x256xf32>
    %95 = arith.addf %90, %94 : vector<1x256xf32>
    %96 = vector.extract_strided_slice %20 {offsets = [2, 0], sizes = [1, 256], strides = [1, 1]} : vector<4x256xf32> to vector<1x256xf32>
    %c2_34 = arith.constant 2 : index
    %c3_35 = arith.constant 3 : index
    %97 = memref.load %arg3[%c2_34, %c3_35] : memref<4x4xf32, #tpu.memory_space<smem>>
    %98 = vector.broadcast %97 : f32 to vector<1x256xf32>
    %99 = arith.mulf %96, %98 : vector<1x256xf32>
    %100 = arith.addf %95, %99 : vector<1x256xf32>
    %101 = vector.extract_strided_slice %20 {offsets = [3, 0], sizes = [1, 256], strides = [1, 1]} : vector<4x256xf32> to vector<1x256xf32>
    %c3_36 = arith.constant 3 : index
    %c3_37 = arith.constant 3 : index
    %102 = memref.load %arg3[%c3_36, %c3_37] : memref<4x4xf32, #tpu.memory_space<smem>>
    %103 = vector.broadcast %102 : f32 to vector<1x256xf32>
    %104 = arith.mulf %101, %103 : vector<1x256xf32>
    %105 = arith.addf %100, %104 : vector<1x256xf32>
    %c3_38 = arith.constant 3 : index
    %106 = memref.load %arg4[%c3_38] : memref<4xf32, #tpu.memory_space<smem>>
    %107 = vector.broadcast %106 : f32 to vector<1x256xf32>
    %108 = arith.addf %105, %107 : vector<1x256xf32>
    %109 = tpu.concatenate %42, %64, %86, %108 in 0 : vector<1x256xf32>, vector<1x256xf32>, vector<1x256xf32>, vector<1x256xf32> -> vector<4x256xf32>
    %c0_39 = arith.constant 0 : index
    %c0_40 = arith.constant 0 : index
    %c0_41 = arith.constant 0 : index
    %110 = vector.load %arg5[%c0_39, %c0_40, %c0_41] : memref<1x4x256xf32, #tpu.memory_space<vmem>>, vector<1x4x256xf32>
    %111 = vector.shape_cast %110 : vector<1x4x256xf32> to vector<4x256xf32>
    %112 = vector.shape_cast %109 : vector<4x256xf32> to vector<1x4x256xf32>
    tpu.vector_store %arg5[%c0_39, %c0_40, %c0_41], %112 {strides = array<i32>} : memref<1x4x256xf32, #tpu.memory_space<vmem>>, vector<1x4x256xf32>,
    return
  }
  func.func @transform_0(%arg0: i32, %arg1: i32) -> (i32, i32, i32) {
    %c0_i32 = arith.constant 0 : i32
    %c0_i32_0 = arith.constant 0 : i32
    return %arg0, %c0_i32, %arg1 : i32, i32, i32
  }
  func.func @transform_1(%arg0: i32, %arg1: i32) -> (i32, i32) {
    %c0_i32 = arith.constant 0 : i32
    %c0_i32_0 = arith.constant 0 : i32
    %c0_i32_1 = arith.constant 0 : i32
    return %c0_i32, %c0_i32_0 : i32, i32
  }
  func.func @transform_2(%arg0: i32, %arg1: i32) -> i32 {
    %c0_i32 = arith.constant 0 : i32
    %c0_i32_0 = arith.constant 0 : i32
    return %c0_i32 : i32
  }
  func.func @transform_3(%arg0: i32, %arg1: i32) -> (i32, i32, i32) {
    %c0_i32 = arith.constant 0 : i32
    %c0_i32_0 = arith.constant 0 : i32
    return %arg0, %c0_i32, %arg1 : i32, i32, i32
  }
}

</mosaic_0001>

<bundles_post_ra>
// kernel: tpu_custom_call.1
= control target key start
LH: loop header
LB: loop body
LE: loop exit
PB: predicated region body
PF: predicated region fallthrough
CT: control target
= control target key end

     0   :  { %s1218_s0 = inlined_call_operand.hbm [shape: f32[2,4,256], index: 0, kind: input, shape index: {}]   ;;  %s1219_s1 = inlined_call_operand.hbm [shape: f32[4,4], index: 1, kind: input, shape index: {}]   ;;  %s1220_s2 = inlined_call_operand.vmem [shape: f32[4], index: 2, kind: input, shape index: {}]   ;;  %s1221_s3 = inlined_call_operand.hbm [shape: f32[2,4,256], index: 3, kind: output, shape index: {}]  }
   0x1   :  { %1227 = sst [smem:[#allocation14_spill]] %s1218_s0 }
   0x2   :  { %8 = vsyncpa [#allocation3], 0 }
   0x3   :  { %10 = vsyncpa [#allocation3 + $0x1], 0 }
   0x4   :  { %11 = vsyncpa [#allocation5], 0 }
   0x5   :  { %12 = vsyncpa [#allocation6], 0 }
   0x6   :  { %13 = vsyncpa [#allocation4], 0 }
   0x7   :  { %15 = vsyncpa [#allocation4 + $0x1], 0  ;;  %s922_s12 = smov 0   ;;  %s924_s13 = smov 0  }
   0x8   :  { %s926_s14 = smov 0   ;;  %s928_s15 = smov 0  }
   0x9   :  { %s930_s16 = smov 0   ;;  %s932_s17 = smov 0  }
   0xa LB: > { %s605_s18 = sadd.s32 4294967295, %s896_s17   ;;  %s606_s19 = sadd.s32 4294967294, %s896_s17   ;;  %s896_s17 = sphi %s932_s17, %s21_s17   ;;  %s892_s16 = sphi %s930_s16, %s1248_s16   ;;  %s888_s15 = sphi %s928_s15, %s1247_s15   ;;  %s884_s14 = sphi %s926_s14, %s1246_s14   ;;  %s880_s13 = sphi %s924_s13, %s1245_s13   ;;  %s876_s12 = sphi %s922_s12, %s1244_s12  }
   0xb   : > { %p55_p0 = scmp.ne.s32.totalorder %s880_s13, %s876_s12  ;;  %p956_p1 = scmp.eq.s32.totalorder %s605_s18, 0 }
   0xc   : > { %p960_p2 = scmp.eq.s32.totalorder %s605_s18, 1  ;;  %p129_p3 = scmp.eq.s32.totalorder %s606_s19, 1 }
   0xd   : > { %s1228_s20 = scalar_select %p956_p1, 1, 0 }
   0xe   : > { %p966_p4 = por %p956_p1, %p55_p0  ;;  %p607_p5 = scmp.ge.s32.totalorder %s896_s17, 1 }
   0xf   : > { %p971_p6 = por %p129_p3, %p55_p0  ;;  %p136_p7 = scmp.lt.s32.totalorder %s896_s17, 3 }
  0x10   : > { %s1230_s22 = scalar_select %p966_p4, 1, 0 }
  0x11   : > { %s1231_s23 = scalar_select %p971_p6, 1, 0 }
  0x12   : > { %p976_p8 = pnand %p607_p5, %p136_p7  ;;  %s158_s27 = sshll.u32 %s1220_s2, 4  ;;  %s159_s27 = int_to_ptr.vmem [resolvable:$true] %s158_s27 }
  0x13   : > { %s33_s29 = sadd.s32 1, %s892_s16  ;;  %s748_s6 = scalar_lea.hbm %s1219_s1, 64 }
  0x14   : > { %s1232_s24 = scalar_select %p976_p8, 1, 0 }
  0x15   : > { %p668_p10 = pneg %p976_p8  ;;  %p993_p12 = scmp.ge.s32.totalorder %s33_s29, 2 }
  0x16   : > { %p749_p13 = scmp.ne.s32.totalorder %s1219_s1, %s748_s6  ;;  %p755_p7 = scmp.lt.u32.totalorder %s748_s6, %s1219_s1 }
  0x17   : > { %p988_p11 = pnand %p668_p10, %p956_p1 }
  0x19   : > { %p750_p0 = pneg %p988_p11 }
  0x1b   : > { %p751_p3 = pnand %p750_p0, %p749_p13 }
  0x1d   : > { %p752_p5 = pneg %p751_p3 }
  0x1f   : > { %p757_p10 = pnand %p755_p7, %p752_p5 }
  0x21   : > { %760 = shalt.err (!%p757_p10)
}
  0x22   : > { %s898_s11 = smov [#allocation7]   ;;  %s761_s25 = scalar_lea.vmem %s159_s27, 16 }
  0x23   : > { %671 = dma.hbm_to_smem (!%p988_p11), %s1219_s1, 64, %s898_s11, [#allocation5]  }
  0x24   : > { %p762_p9 = scmp.ne.s32.totalorder %s159_s27, %s761_s25  ;;  %p769_p4 = scmp.lt.s32.totalorder %s159_s27, %s159_s27 }
  0x25   : > { %p770_p13 = scmp.lt.s32.totalorder %s761_s25, %s761_s25 }
  0x26   : > { %p764_p6 = pnand %p762_p9, %p750_p0 }
  0x27   : > { %p771_p3 = por %p770_p13, %p769_p4 }
  0x28   : > { %p765_p1 = pneg %p764_p6 }
  0x2a   : > { %p772_p8 = pnand %p771_p3, %p765_p1 }
  0x2c   : > { %775 = shalt.err (!%p772_p8)
}
  0x2d   : > { %s899_s26 = smov [#allocation8]   ;;  %s1250_s29 = smov (%p993_p12, %s33_s29), 0 }
  0x2e   : > { %674 = dma.vmem_to_smem (!%p988_p11), %s159_s27, 16, %s899_s26, [#allocation6]  }
  0x2f   : > { %s42_s4 = sadd.s32 1, %s884_s14  ;;  %p49_p1 = scmp.ne.s32.totalorder %s884_s14, %s880_s13 }
  0x30   : > { %s37_s5 = ssub.s32 %s892_s16, %s1250_s29  ;;  %p50_p4 = scmp.eq.s32.totalorder %s896_s17, 0 }
  0x31   : > { %p40_p6 = scmp.eq.s32.totalorder %s37_s5, 0  ;;  %p1027_p8 = por %p960_p2, %p49_p1 }
  0x32   : > { %p51_p9 = por %p50_p4, %p49_p1  ;;  %p685_p0 = scmp.lt.s32.totalorder %s896_s17, 2 }
  0x33   : > { %s1033_s6 = scalar_select %p40_p6, %s884_s14, %s42_s4  }
  0x34   : > { %s169_s7 = sand.u32 1, %s884_s14   ;;  %s654_s27 = sshll.u32 %s892_s16, 7 }
  0x35   : > { %s611_s30 = sshll.u32 %s169_s7, 3  ;;  %s1236_s0 = sld [smem:[#allocation14_spill]] }
  0x36   : > { %s173_s21 = scalar_lea.vmem [#allocation2], %s611_s30  ;;  %p1042_p2 = pnand %p685_p0, %p51_p9 }
  0x37   : > { %s183_s11 = sshll.u32 %s173_s21, 4  ;;  %s170_s19 = scalar_lea.sflag [#allocation3], %s169_s7  ;;  %s1046_s11 = int_to_ptr.vmem [resolvable:$true] %s183_s11 }
  0x38   : > { %p778_p12 = pneg %p1042_p2 }
  0x3b   : > { %s1040_s10 = scalar_lea.hbm %s1236_s0, %s654_s27  ;;  %s781_s5 = scalar_lea.hbm %s1236_s0, 256 }
  0x3c   : > { %s776_s25 = scalar_lea.hbm %s1040_s10, 128  ;;  %p782_p10 = scmp.lt.u32.totalorder %s1040_s10, %s1236_s0 }
  0x3d   : > { %p777_p11 = scmp.ne.s32.totalorder %s1040_s10, %s776_s25  ;;  %p783_p13 = scmp.lt.u32.totalorder %s781_s5, %s776_s25 }
  0x3e   : > { %p785_p1 = scmp.lt.u32.totalorder %s776_s25, %s1040_s10 }
  0x3f   : > { %p779_p5 = pnand %p778_p12, %p777_p11  ;;  %p784_p3 = por %p783_p13, %p782_p10 }
  0x41   : > { %p780_p7 = pneg %p779_p5  ;;  %p786_p4 = por %p785_p1, %p784_p3 }
  0x43   : > { %p787_p6 = pnand %p786_p4, %p780_p7 }
  0x45   : > { %790 = shalt.err (!%p787_p6)
}
  0x46   : > { %s791_s7 = scalar_lea.vmem %s1046_s11, 128  ;;  %s900_s8 = smov [#allocation2]  }
  0x47   : > { %p792_p9 = scmp.ne.s32.totalorder %s1046_s11, %s791_s7  ;;  %s796_s9 = sshll.u32 %s900_s8, 4  ;;  %s797_s9 = int_to_ptr.vmem [resolvable:$false] %s796_s9 }
  0x48   : > { %s798_s21 = scalar_lea.vmem %s797_s9, 256  ;;  %p799_p5 = scmp.lt.s32.totalorder %s1046_s11, %s797_s9 }
  0x49   : > { %p794_p0 = pnand %p792_p9, %p778_p12  ;;  %p800_p10 = scmp.lt.s32.totalorder %s798_s21, %s791_s7 }
  0x4b   : > { %p795_p11 = pneg %p794_p0  ;;  %p801_p13 = por %p800_p10, %p799_p5 }
  0x4d   : > { %p802_p3 = pnand %p801_p13, %p795_p11 }
  0x4f   : > { %805 = shalt.err (!%p802_p3)
}
  0x50   : > { %678 = dma.hbm_to_vmem [thread:$0]  (!%p1042_p2), %s1040_s10, 128, %s1046_s11, %s170_s19  }
  0x51   : > { %p1238_p7 = scmp.ne.s32.totalorder %s1232_s24, 0 }
  0x52   : > { %s1076_s25 = sand.u32 (!%p1238_p7), 1, %s880_s13   ;;  %p1239_p12 = scmp.ne.s32.totalorder (!%p1238_p7), %s1230_s22, 0 }
  0x53   : > { %192 = sbr.rel (%p1238_p7) target bundleno = 207 (0xcf), region = 32  ;;  %s1226_s26 = sshll.u32 (!%p1238_p7), %s1076_s25, 3 }
  0x54   : > { %s195_s4 = scalar_lea.sflag (!%p1238_p7), [#allocation3], %s1076_s25  ;;  %s198_s5 = scalar_lea.vmem (!%p1238_p7), [#allocation2], %s1226_s26 }
  0x5a   : > { %859 = dma.done.wait (%p1239_p12), %s195_s4, 128  }
  0x5b   : > { %861 = vsyncadd (%p1239_p12), %s195_s4, 4294967168  ;;  %p1240_p2 = scmp.ne.s32.totalorder %s1228_s20, 0 }
  0x5d   : > { %863 = dma.done.wait (%p1240_p2), [#allocation5], 64  }
  0x5e   : > { %865 = vsyncadd (%p1240_p2), [#allocation5], 4294967232 }
  0x5f   : > { %867 = dma.done.wait (%p1240_p2), [#allocation6], 16  }
  0x60   : > { %869 = vsyncadd (%p1240_p2), [#allocation6], 4294967280 }
  0x61   : > { %211 = sfence }
  0x62   : > { %v232_v0 = vld [vmem:[%s198_s5] sm:$0xff]  ;;  %vm236_vm0 = vcmask 1043456   ;;  %s1102_s20 = sld [smem:[#allocation7]]  ;;  %s1112_s18 = sld [smem:[#allocation7 + $0x1]]  ;;  %v423_v50 = vlaneseq  ;;  %vm466_vm5 = vcmask 1040384   ;;  %vm469_vm6 = vcmask 1041408  }
  0x63   : > { %v234_v1 = vcombine.high %v232_v0, %v232_v0  ;;  %v237_v2 = vsel %vm236_vm0, %v232_v0, 0.0  ;;  %s1104_s22 = sld [smem:[#allocation7 + $0x80]]  ;;  %s1114_s19 = sld [smem:[#allocation7 + $0x81]]  ;;  %vm472_vm7 = vcmask 1042432  }
  0x64   : > { %v238_v3 = vrot.slane %v237_v2, 4  ;;  %s1106_s24 = sld [smem:[#allocation7 + $0x100]]  ;;  %s1116_s27 = sld [smem:[#allocation7 + $0x101]]  ;;  %v424_v56 = vshrl.u32 %v423_v50, 7 }
  0x65   : > { %v244_v4 = vsel %vm236_vm0, %v234_v1, 0.0  ;;  %s1108_s10 = sld [smem:[#allocation7 + $0x180]]  ;;  %s1118_s30 = sld [smem:[#allocation7 + $0x181]] }
  0x66   : > { %v239_v5 = vadd.f32 %v238_v3, %v237_v2  ;;  %v245_v6 = vrot.slane %v244_v4, 4  ;;  %s1110_s11 = sld [smem:[#allocation8]]  ;;  %s1120_s7 = sld [smem:[#allocation7 + $0x2]] }
  0x67   : > { %s1122_s8 = sld [smem:[#allocation7 + $0x82]]  ;;  %s1128_s4 = sld [smem:[#allocation7 + $0x3]] }
  0x68   : > { %v240_v7 = vrot.slane %v239_v5, 2  ;;  %v246_v8 = vadd.f32 %v245_v6, %v244_v4  ;;  %s1124_s9 = sld [smem:[#allocation7 + $0x102]]  ;;  %s1130_s5 = sld [smem:[#allocation7 + $0x83]]  ;;  %v303_v53 = vstv %s1102_s20  ;;  %v333_v60 = vstv %s1112_s18 }
  0x69   : > { %s1126_s21 = sld [smem:[#allocation7 + $0x182]]  ;;  %s1132_s26 = sld [smem:[#allocation7 + $0x103]]  ;;  %v306_v54 = vstv %s1104_s22  ;;  %v336_v61 = vstv %s1114_s19 }
  0x6a   : > { %v241_v9 = vadd.f32 %v240_v7, %v239_v5  ;;  %v247_v10 = vrot.slane %v246_v8, 2  ;;  %s1134_s0 = sld [smem:[#allocation7 + $0x183]]  ;;  %v314_v55 = vstv %s1106_s24  ;;  %v344_v62 = vstv %s1116_s27  ;;  %s1154_s20 = sld [smem:[#allocation8 + $0x1]] }
  0x6b   : > { %v322_v58 = vstv %s1108_s10  ;;  %v352_v63 = vstv %s1118_s30  ;;  %s1156_s22 = sld [smem:[#allocation8 + $0x2]]  ;;  %s1241_s24 = sshll.u32 %s1076_s25, 3 }
  0x6c   : > { %v242_v11 = vrot.slane %v241_v9, 1  ;;  %v248_v12 = vadd.f32 %v247_v10, %v246_v8  ;;  %v330_v59 = vstv %s1110_s11  ;;  %s229_s10 = scalar_lea.vmem [#allocation9], %s1241_s24  ;;  %s481_s30 = scalar_lea.sflag [#allocation4], %s1076_s25 }
  0x6d   : > { %v366_v2 = vstv %s1122_s8  ;;  %v393_v5 = vstv %s1128_s4  ;;  %s497_s11 = sshll.u32 %s229_s10, 4  ;;  %s1171_s11 = int_to_ptr.vmem [resolvable:$true] %s497_s11 }
  0x6e   : > { %v243_v13 = vadd.f32 %v242_v11, %v241_v9  ;;  %v249_v14 = vrot.slane %v248_v12, 1  ;;  %v374_v3 = vstv %s1124_s9  ;;  %v396_v6 = vstv %s1130_s5 }
  0x6f   : > { %v382_v4 = vstv %s1126_s21  ;;  %v404_v7 = vstv %s1132_s26  ;;  %s655_s26 = sshll.u32 %s888_s15, 7  ;;  %s901_s15 = smov [#allocation9]  }
  0x70   : > { %v250_v15 = vadd.f32 %v249_v14, %v248_v12  ;;  %v252_v16 = vmul.f32 0.25, %v243_v13  ;;  %v412_v8 = vstv %s1134_s0  ;;  %s1158_s0 = sld [smem:[#allocation8 + $0x3]]  ;;  %s1169_s27 = scalar_lea.hbm %s1221_s3, %s655_s26 }
  0x71   : > { %v390_v50 = vstv %s1156_s22  ;;  %s810_s8 = sshll.u32 %s901_s15, 4  ;;  %s811_s8 = int_to_ptr.vmem [resolvable:$false] %s810_s8 }
  0x72   : > { %v253_v17 = vmul.f32 0.25, %v250_v15  ;;  %s812_s9 = scalar_lea.vmem %s811_s8, 256  ;;  %p813_p9 = scmp.lt.s32.totalorder %s1171_s11, %s811_s8 }
  0x74   : > { %v256_v18 = vcombine.low %v252_v16, %v253_v17 }
  0x76   : > { %v1096_v19 = vsub.f32 %v232_v0, %v256_v18  ;;  %v363_v0 = vstv %s1120_s7  ;;  %s806_s7 = scalar_lea.vmem %s1171_s11, 128 }
  0x77   : > { %p807_p1 = scmp.ne.s32.totalorder %s1171_s11, %s806_s7  ;;  %p814_p0 = scmp.lt.s32.totalorder %s812_s9, %s806_s7 }
  0x78   : > { %v259_v20 = vmul.f32 %v1096_v19, %v1096_v19 }
  0x79   : > { %p808_p4 = pnand %p807_p1, %p1027_p8  ;;  %p815_p11 = por %p814_p0, %p813_p9 }
  0x7a   : > { %v261_v21 = vcombine.high %v259_v20, %v259_v20  ;;  %v263_v22 = vsel %vm236_vm0, %v259_v20, 0.0 }
  0x7b   : > { %v264_v23 = vrot.slane %v263_v22, 4  ;;  %p809_p6 = pneg %p808_p4 }
  0x7c   : > { %v270_v24 = vsel %vm236_vm0, %v261_v21, 0.0 }
  0x7d   : > { %v265_v25 = vadd.f32 %v264_v23, %v263_v22  ;;  %v271_v26 = vrot.slane %v270_v24, 4  ;;  %p816_p5 = pnand %p815_p11, %p809_p6 }
  0x7f   : > { %v266_v27 = vrot.slane %v265_v25, 2  ;;  %v272_v28 = vadd.f32 %v271_v26, %v270_v24 }
  0x81   : > { %v267_v29 = vadd.f32 %v266_v27, %v265_v25  ;;  %v273_v30 = vrot.slane %v272_v28, 2 }
  0x83   : > { %v268_v31 = vrot.slane %v267_v29, 1  ;;  %v274_v32 = vadd.f32 %v273_v30, %v272_v28 }
  0x85   : > { %v269_v33 = vadd.f32 %v268_v31, %v267_v29  ;;  %v275_v34 = vrot.slane %v274_v32, 1 }
  0x87   : > { %v276_v35 = vadd.f32 %v275_v34, %v274_v32  ;;  %v277_v36 = vmul.f32 0.25, %v269_v33 }
  0x89   : > { %v278_v37 = vmul.f32 0.25, %v276_v35  ;;  %740 = vrsqrt.f32 %v277_v36  ;;  %vm281_vm1 = vcmp.eq.f32.partialorder %v277_v36, inf  ;;  %v284_v39 = vand.u32 2147483648, %v277_v36 }
  0x8a   : > { %vm283_vm2 = vcmp.eq.f32.partialorder %v277_v36, 0.0 }
  0x8b   : > { %742 = vrsqrt.f32 %v278_v37  ;;  %vm288_vm3 = vcmp.eq.f32.partialorder %v278_v37, inf  ;;  %v291_v42 = vand.u32 2147483648, %v278_v37  ;;  %vm290_vm4 = vcmp.eq.f32.partialorder %v278_v37, 0.0 }
  0x93   : > { %v741_v38 = vpop.eup %740 }
  0x94   : > { %v280_v40 = vmul.f32 %v741_v38, %v277_v36 }
  0x95   : > { %v743_v41 = vpop.eup %742 }
  0x96   : > { %v282_v43 = vsel %vm281_vm1, %v277_v36, %v280_v40  ;;  %v287_v44 = vmul.f32 %v743_v41, %v278_v37 }
  0x97   : > { %v285_v45 = vsel %vm283_vm2, %v284_v39, %v282_v43  ;;  %v425_v43 = vsub.s32 0, %v424_v56 }
  0x98   : > { %v289_v46 = vsel %vm288_vm3, %v278_v37, %v287_v44  ;;  %v293_v47 = vadd.f32 1e-05, %v285_v45  ;;  %v429_v44 = vsub.s32 4, %v424_v56 }
  0x99   : > { %v292_v48 = vsel %vm290_vm4, %v291_v42, %v289_v46  ;;  %v360_v42 = vstv %s1154_s20 }
  0x9a   : > { %v294_v49 = vadd.f32 1e-05, %v292_v48  ;;  %744 = vrcp.f32 %v293_v47 }
  0x9c   : > { %746 = vrcp.f32 %v294_v49 }
  0xa4   : > { %v745_v51 = vpop.eup %744 }
  0xa6   : > { %v747_v52 = vpop.eup %746 }
  0xa7   : > { %v299_v57 = vcombine.low %v745_v51, %v747_v52 }
  0xa9   : > { %v301_v1 = vmul.f32 %v299_v57, %v1096_v19 }
  0xab   : > { %v304_v9 = vmul.f32 %v303_v53, %v301_v1  ;;  %v307_v10 = vmul.f32 %v306_v54, %v301_v1  ;;  %v315_v11 = vmul.f32 %v314_v55, %v301_v1  ;;  %v323_v12 = vmul.f32 %v322_v58, %v301_v1 }
  0xac   : > { %v334_v13 = vmul.f32 %v333_v60, %v301_v1  ;;  %v337_v14 = vmul.f32 %v336_v61, %v301_v1  ;;  %v345_v15 = vmul.f32 %v344_v62, %v301_v1  ;;  %v353_v16 = vmul.f32 %v352_v63, %v301_v1 }
  0xad   : > { %v620_v17 = vrot.slane %v307_v10, 9  ;;  %v622_v18 = vrot.slane %v315_v11, 10  ;;  %v624_v19 = vrot.slane %v323_v12, 11  ;;  %v364_v20 = vmul.f32 %v363_v0, %v301_v1 }
  0xae   : > { %v627_v21 = vrot.slane %v337_v14, 9  ;;  %v629_v22 = vrot.slane %v345_v15, 10  ;;  %v631_v23 = vrot.slane %v353_v16, 11  ;;  %v367_v24 = vmul.f32 %v366_v2, %v301_v1 }
  0xaf   : > { %v312_v25 = vadd.f32 %v620_v17, %v304_v9  ;;  %v375_v26 = vmul.f32 %v374_v3, %v301_v1  ;;  %v383_v27 = vmul.f32 %v382_v4, %v301_v1  ;;  %v394_v28 = vmul.f32 %v393_v5, %v301_v1 }
  0xb0   : > { %v342_v29 = vadd.f32 %v627_v21, %v334_v13  ;;  %v635_v30 = vrot.slane %v367_v24, 9  ;;  %v397_v31 = vmul.f32 %v396_v6, %v301_v1  ;;  %v405_v32 = vmul.f32 %v404_v7, %v301_v1 }
  0xb1   : > { %v320_v33 = vadd.f32 %v622_v18, %v312_v25  ;;  %v637_v34 = vrot.slane %v375_v26, 10  ;;  %v639_v35 = vrot.slane %v383_v27, 11  ;;  %v413_v36 = vmul.f32 %v412_v8, %v301_v1 }
  0xb2   : > { %v350_v37 = vadd.f32 %v629_v22, %v342_v29  ;;  %v372_v38 = vadd.f32 %v635_v30, %v364_v20  ;;  %v643_v39 = vrot.slane %v397_v31, 9  ;;  %v645_v40 = vrot.slane %v405_v32, 10 }
  0xb3   : > { %v328_v41 = vadd.f32 %v624_v19, %v320_v33  ;;  %v647_v48 = vrot.slane %v413_v36, 11  ;;  %v420_v54 = vstv %s1158_s0 }
  0xb4   : > { %v358_v45 = vadd.f32 %v631_v23, %v350_v37  ;;  %v380_v46 = vadd.f32 %v637_v34, %v372_v38  ;;  %v402_v47 = vadd.f32 %v643_v39, %v394_v28 }
  0xb5   : > { %v331_v49 = vadd.f32 %v330_v59, %v328_v41 }
  0xb6   : > { %v361_v51 = vadd.f32 %v360_v42, %v358_v45  ;;  %v388_v52 = vadd.f32 %v639_v35, %v380_v46  ;;  %v410_v53 = vadd.f32 %v645_v40, %v402_v47 }
  0xb7   : > { %v426_v55 = vrot.slane %v331_v49, %v425_v43  ;;  %v430_v57 = vrot.slane %v331_v49, %v429_v44 }
  0xb8   : > { %v391_v58 = vadd.f32 %v390_v50, %v388_v52  ;;  %v418_v60 = vadd.f32 %v647_v48, %v410_v53  ;;  %v437_v61 = vrot.slane %v361_v51, %v425_v43  ;;  %v441_v62 = vrot.slane %v361_v51, %v429_v44 }
  0xba   : > { %v421_v56 = vadd.f32 %v420_v54, %v418_v60  ;;  %v448_v63 = vrot.slane %v391_v58, %v425_v43  ;;  %v452_v0 = vrot.slane %v391_v58, %v429_v44  ;;  %v467_v1 = vsel %vm466_vm5, %v426_v55, %v437_v61 }
  0xbb   : > { %v468_v59 = vsel %vm466_vm5, %v430_v57, %v441_v62 }
  0xbc   : > { %v459_v2 = vrot.slane %v421_v56, %v425_v43  ;;  %v463_v3 = vrot.slane %v421_v56, %v429_v44  ;;  %v470_v4 = vsel %vm469_vm6, %v467_v1, %v448_v63  ;;  %v471_v5 = vsel %vm469_vm6, %v468_v59, %v452_v0 }
  0xbe   : > { %v473_v6 = vsel %vm472_vm7, %v470_v4, %v459_v2  ;;  %v474_v7 = vsel %vm472_vm7, %v471_v5, %v463_v3 }
  0xbf   : > { %v477_v8 = vcombine.low %v473_v6, %v474_v7 }
  0xc1   : > { %479 = vst [vmem:[%s229_s10] sm:$0xff] %v477_v8 }
  0xc2   : > { %819 = shalt.err (!%p816_p5)
}
  0xc3   : > { %s820_s25 = scalar_lea.hbm %s1169_s27, 128  ;;  %s824_s5 = scalar_lea.hbm %s1221_s3, 256 }
  0xc4   : > { %p821_p10 = scmp.ne.s32.totalorder %s1169_s27, %s820_s25  ;;  %p825_p7 = scmp.lt.u32.totalorder %s1169_s27, %s1221_s3 }
  0xc5   : > { %p826_p12 = scmp.lt.u32.totalorder %s824_s5, %s820_s25  ;;  %p828_p1 = scmp.lt.u32.totalorder %s820_s25, %s1169_s27 }
  0xc6   : > { %p822_p13 = pnand %p821_p10, %p1027_p8 }
  0xc7   : > { %p827_p2 = por %p826_p12, %p825_p7 }
  0xc8   : > { %p823_p3 = pneg %p822_p13 }
  0xc9   : > { %p829_p4 = por %p828_p1, %p827_p2 }
  0xcb   : > { %p830_p6 = pnand %p829_p4, %p823_p3 }
  0xcd   : > { %833 = shalt.err (!%p830_p6)
}
  0xce   : > { %666 = dma.vmem_to_hbm [thread:$0]  (%p1027_p8), %s1171_s11, 128, %s1169_s27, %s481_s30  }
  0xcf PF: > { %s509_s0 = sand.u32 1, %s876_s12   ;;  %p1242_p9 = scmp.ne.s32.totalorder %s1231_s23, 0 }
  0xd0   : > { %p1243_p0 = scmp.ge.s32.totalorder %s896_s17, 2  ;;  %s510_s26 = scalar_lea.sflag [#allocation4], %s509_s0 }
  0xd2   : > { %p680_p11 = pnand %p1243_p0, %p1242_p9 }
  0xd4   : > { %871 = dma.done.wait (!%p680_p11), %s510_s26, 128  }
  0xd5   : > { %873 = vsyncadd (!%p680_p11), %s510_s26, 4294967168  ;;  %s21_s17 = sadd.s32 1, %s896_s17   ;;  %s1244_s12 = smov %s880_s13 }
  0xd6   : > { %p18_p5 = scmp.ge.s32.totalorder %s21_s17, 4   ;;  %s1245_s13 = smov %s884_s14 }
  0xd7   : > { %s1246_s14 = smov %s1033_s6  ;;  %s1247_s15 = smov %s892_s16 }
  0xd8   : > { %s1248_s16 = smov %s1250_s29  ;;  %20 = sbr.rel (!%p18_p5) target bundleno = 10 (0xa), region = 87 }
  0xdf   :  { %515 = vsyncpa [#allocation3], 1 }
  0xe0   :  { %517 = vsyncpa [#allocation3 + $0x1], 1 }
  0xe1   :  { %518 = vsyncpa [#allocation4], 1 }
  0xe2   :  { %520 = vsyncpa [#allocation4 + $0x1], 1 }
  0xe3   :  { %521 = vsyncpa [#allocation5], 1 }
  0xe4   :  { %523 = vsyncpa [#allocation5 + $0x1], 1 }
  0xe5   :  { %524 = vsyncpa [#allocation6], 1 }
  0xe6   :  { %526 = vsyncpa [#allocation6 + $0x1], 1 }

</bundles_post_ra>
